<compile_context>
chip_gen: v6e
topology: v6e:2x2x1
jax: 0.10.0
libtpu: 0.0.40
codegen_flags: <defaults>
</compile_context>

<pallas_src>
import numpy as np
import jax
import jax.numpy as jnp
from jax import lax
from jax.experimental import pallas as pl
from jax.experimental.pallas import tpu as pltpu

KH = KW = 3  # kernel_size = 3


def _erf(z):
    # Abramowitz & Stegun 7.1.26 rational approximation (max abs err ~1.5e-7), matching
    # nn.GELU()'s exact-erf semantics well within the test tolerance.
    a1, a2, a3, a4, a5 = 0.254829592, -0.284496736, 1.421413741, -1.453152027, 1.061405429
    p = 0.3275911
    az = jnp.abs(z)
    t = 1.0 / (1.0 + p * az)
    poly = ((((a5 * t + a4) * t + a3) * t + a2) * t + a1) * t
    y = 1.0 - poly * jnp.exp(-az * az)
    return jnp.where(z >= 0.0, y, -y)


def _gelu_exact(x):
    return 0.5 * x * (1.0 + _erf(x * 0.7071067811865476))


def _convt_bn_gelu_kernel(xim_ref, w_ref, bias_ref, o_ref):
    # xim_ref : (1, 9*Cin, H*W)  im2col input, spatial on lanes
    # w_ref   : (Cout, 9*Cin)    folded (flipped + channel-transposed + BN-scaled) weight
    # bias_ref: (Cout, 1)        folded BN bias, broadcasts along lanes
    # o_ref   : (1, Cout, H*W)   lane-dense output tile
    acc = jnp.dot(w_ref[...], xim_ref[0, :, :],
                  preferred_element_type=jnp.float32)          # (Cout, H*W), single MXU issue
    y = acc + bias_ref[...]                                    # (Cout, H*W) + (Cout, 1)
    o_ref[0, :, :] = _gelu_exact(y).astype(o_ref.dtype)        # bulk unmasked store


@jax.jit
def conv_transpose_bn_gelu(x_nchw, wt, gamma, beta, run_mean, run_var, eps=1e-5):
    """ConvTranspose2d(Cin, Cout, 3, stride=1, padding=1, bias=False) + BN(eval) + GELU.

    x_nchw : (N, Cin, H, W) float32 (PyTorch layout)
    wt     : (Cin, Cout, 3, 3) float32 (PyTorch ConvTranspose2d weight layout)
    returns: (N, Cout, H, W) float32
    """
    # TODO(synk): BatchNorm is implemented in inference (running-stats) mode only;
    #             training-mode batch statistics are not computed in-kernel.
    N, Cin, H, W = x_nchw.shape
    Cout = wt.shape[1]
    K = KH * KW * Cin
    HW = H * W

    # ConvTranspose2d(s=1, p=1, k=3) == direct "same" conv with the spatially flipped,
    # channel-transposed kernel.  Fold the BN scale into the weight (conv is linear).
    wd = jnp.transpose(wt[:, :, ::-1, ::-1], (2, 3, 0, 1))            # (KH, KW, Cin, Cout)
    scale = gamma / jnp.sqrt(run_var + eps)                           # (Cout,)
    w_folded = (wd * scale[None, None, None, :]).astype(jnp.float32)
    w2d = jnp.transpose(w_folded.reshape(K, Cout), (1, 0))            # (Cout, 9*Cin)
    bias = (beta - run_mean * scale).astype(jnp.float32).reshape(Cout, 1)

    # Channel-major im2col in the wrapper (fuses with the pad under jit; total data is
    # tiny at these shapes).  k index ordering = (kh*KW + kw)*Cin + ci matches w2d.
    xp = jnp.pad(x_nchw, ((0, 0), (0, 0), (1, 1), (1, 1)))            # (N, Cin, H+2, W+2)
    slabs = [xp[:, :, kh:kh + H, kw:kw + W]
             for kh in range(KH) for kw in range(KW)]                 # 9 x (N, Cin, H, W)
    xim = jnp.stack(slabs, axis=1).reshape(N, K, HW)                  # (N, 9*Cin, H*W)

    # TODO(synk): for large H/W/C add spatial tiling of the H*W lane axis (keep blocks
    #             sized against v7x's 64 MiB VMEM / 32 MiB default scoped limit, roughly
    #             half the v5e/v6e tile, and set vmem_limit_bytes explicitly).
    out_flat = pl.pallas_call(
        _convt_bn_gelu_kernel,
        out_shape=jax.ShapeDtypeStruct((N, Cout, HW), jnp.float32),
        grid_spec=pltpu.PrefetchScalarGridSpec(
            num_scalar_prefetch=0,
            grid=(N,),
            in_specs=[
                pl.BlockSpec((1, K, HW), lambda n: (n, 0, 0)),
                pl.BlockSpec((Cout, K), lambda n: (0, 0)),     # constant -> VMEM resident
                pl.BlockSpec((Cout, 1), lambda n: (0, 0)),     # constant -> VMEM resident
            ],
            out_specs=pl.BlockSpec((1, Cout, HW), lambda n: (n, 0, 0)),
        ),
        compiler_params=pltpu.CompilerParams(dimension_semantics=("parallel",)),
    )(xim, w2d, bias)

    # (N, Cout, H*W) -> (N, Cout, H, W): free reshape, no output transpose pass.
    return out_flat.reshape(N, Cout, H, W)


if __name__ == "__main__":
    key = jax.random.PRNGKey(0)
    N, Cin, Cout, H, W = 2, 4, 8, 16, 16
    k1, k2 = jax.random.split(key)

    # Deterministic synthetic parameters (shapes from the module's __init__).
    x = jax.random.normal(k1, (N, Cin, H, W), jnp.float32)
    wt = 0.1 * jax.random.normal(k2, (Cin, Cout, KH, KW), jnp.float32)  # ConvTranspose2d weight
    gamma = 1.0 + 0.1 * jnp.arange(Cout, dtype=jnp.float32)             # BN weight
    beta = 0.05 * jnp.arange(Cout, dtype=jnp.float32)                   # BN bias
    rmean = 0.01 * jnp.arange(Cout, dtype=jnp.float32)                  # BN running_mean
    rvar = 1.0 + 0.02 * jnp.arange(Cout, dtype=jnp.float32)             # BN running_var
    eps = 1e-5

    out = jax.block_until_ready(
        conv_transpose_bn_gelu(x, wt, gamma, beta, rmean, rvar, eps))
    assert out.shape == (N, Cout, H, W)

    # Pure-JAX reference (same math, HIGHEST precision, exact erf GELU).
    xn = jnp.transpose(x, (0, 2, 3, 1))
    wd = jnp.transpose(wt[:, :, ::-1, ::-1], (2, 3, 0, 1))
    xp = jnp.pad(xn, ((0, 0), (1, 1), (1, 1), (0, 0)))
    ref = jnp.zeros((N, H, W, Cout), jnp.float32)
    for kh in range(KH):
        for kw in range(KW):
            ref = ref + jnp.einsum('nhwc,co->nhwo',
                                   xp[:, kh:kh + H, kw:kw + W, :], wd[kh, kw],
                                   precision=lax.Precision.HIGHEST)
    scale = gamma / jnp.sqrt(rvar + eps)
    ref = ref * scale + (beta - rmean * scale)
    ref = 0.5 * ref * (1.0 + jax.scipy.special.erf(ref / jnp.sqrt(2.0)))
    ref = jnp.transpose(ref, (0, 3, 1, 2))

    np.testing.assert_allclose(np.asarray(out), np.asarray(ref), rtol=1e-3, atol=1e-3)
    print("KERNEL_OK")
</pallas_src>

<mosaic_0001>
module attributes {stable_mosaic.version = 11 : i64} {
  func.func @_convt_bn_gelu_kernel(%arg0: i32, %arg1: memref<1x36x256xf32, #tpu.memory_space<vmem>>, %arg2: memref<8x36xf32, #tpu.memory_space<vmem>>, %arg3: memref<8x1xf32, #tpu.memory_space<vmem>>, %arg4: memref<1x8x256xf32, #tpu.memory_space<vmem>>) attributes {dimension_semantics = [#tpu.dimension_semantics<parallel>], iteration_bounds = array<i64: 2>, scalar_prefetch = 0 : i64, scratch_operands = 0 : i64, tpu.core_type = #tpu.core_type<tc>, window_params = [{transform_indices = @transform_0, window_bounds = array<i64: 1, 36, 256>}, {pipeline_mode = #tpu.pipeline_mode<synchronous>, transform_indices = @transform_1, window_bounds = array<i64: 8, 36>}, {pipeline_mode = #tpu.pipeline_mode<synchronous>, transform_indices = @transform_2, window_bounds = array<i64: 8, 1>}, {transform_indices = @transform_3, window_bounds = array<i64: 1, 8, 256>}]} {
    %c0 = arith.constant 0 : index
    %c0_0 = arith.constant 0 : index
    %0 = vector.load %arg2[%c0, %c0_0] : memref<8x36xf32, #tpu.memory_space<vmem>>, vector<8x36xf32>
    %c0_1 = arith.constant 0 : index
    %c0_2 = arith.constant 0 : index
    %c0_3 = arith.constant 0 : index
    %1 = vector.load %arg1[%c0_1, %c0_2, %c0_3] : memref<1x36x256xf32, #tpu.memory_space<vmem>>, vector<1x36x256xf32>
    %2 = vector.shape_cast %1 : vector<1x36x256xf32> to vector<36x256xf32>
    %cst = arith.constant dense<0.000000e+00> : vector<8x256xf32>
    %3 = tpu.matmul %0, %2, %cst {dimension_numbers = #tpu.dot_dimension_numbers<[1], [0], [0], [1], [0, 0, 1, 1], [], []>} : vector<8x36xf32>, vector<36x256xf32>, vector<8x256xf32> -> vector<8x256xf32>
    %c0_4 = arith.constant 0 : index
    %c0_5 = arith.constant 0 : index
    %4 = vector.load %arg3[%c0_4, %c0_5] : memref<8x1xf32, #tpu.memory_space<vmem>>, vector<8x1xf32>
    %5 = vector.broadcast %4 : vector<8x1xf32> to vector<8x256xf32>
    %6 = arith.addf %3, %5 : vector<8x256xf32>
    %cst_6 = arith.constant 5.000000e-01 : f32
    %7 = vector.broadcast %cst_6 : f32 to vector<8x256xf32>
    %8 = arith.mulf %7, %6 : vector<8x256xf32>
    %cst_7 = arith.constant 0.707106769 : f32
    %9 = vector.broadcast %cst_7 : f32 to vector<8x256xf32>
    %10 = arith.mulf %6, %9 : vector<8x256xf32>
    %11 = math.absf %10 : vector<8x256xf32>
    %cst_8 = arith.constant 0.327591091 : f32
    %12 = vector.broadcast %cst_8 : f32 to vector<8x256xf32>
    %13 = arith.mulf %12, %11 : vector<8x256xf32>
    %cst_9 = arith.constant 1.000000e+00 : f32
    %14 = vector.broadcast %cst_9 : f32 to vector<8x256xf32>
    %15 = arith.addf %14, %13 : vector<8x256xf32>
    %cst_10 = arith.constant 1.000000e+00 : f32
    %16 = vector.broadcast %cst_10 : f32 to vector<8x256xf32>
    %17 = arith.divf %16, %15 : vector<8x256xf32>
    %cst_11 = arith.constant 1.06140542 : f32
    %18 = vector.broadcast %cst_11 : f32 to vector<8x256xf32>
    %19 = arith.mulf %18, %17 : vector<8x256xf32>
    %cst_12 = arith.constant -1.45315206 : f32
    %20 = vector.broadcast %cst_12 : f32 to vector<8x256xf32>
    %21 = arith.addf %19, %20 : vector<8x256xf32>
    %22 = arith.mulf %21, %17 : vector<8x256xf32>
    %cst_13 = arith.constant 1.42141378 : f32
    %23 = vector.broadcast %cst_13 : f32 to vector<8x256xf32>
    %24 = arith.addf %22, %23 : vector<8x256xf32>
    %25 = arith.mulf %24, %17 : vector<8x256xf32>
    %cst_14 = arith.constant -0.284496725 : f32
    %26 = vector.broadcast %cst_14 : f32 to vector<8x256xf32>
    %27 = arith.addf %25, %26 : vector<8x256xf32>
    %28 = arith.mulf %27, %17 : vector<8x256xf32>
    %cst_15 = arith.constant 0.254829586 : f32
    %29 = vector.broadcast %cst_15 : f32 to vector<8x256xf32>
    %30 = arith.addf %28, %29 : vector<8x256xf32>
    %31 = arith.mulf %30, %17 : vector<8x256xf32>
    %cst_16 = arith.constant 0.000000e+00 : f32
    %32 = vector.broadcast %cst_16 : f32 to vector<8x256xf32>
    %33 = arith.subf %32, %11 : vector<8x256xf32>
    %34 = arith.mulf %33, %11 : vector<8x256xf32>
    %35 = math.exp %34 : vector<8x256xf32>
    %36 = arith.mulf %31, %35 : vector<8x256xf32>
    %cst_17 = arith.constant 1.000000e+00 : f32
    %37 = vector.broadcast %cst_17 : f32 to vector<8x256xf32>
    %38 = arith.subf %37, %36 : vector<8x256xf32>
    %cst_18 = arith.constant 0.000000e+00 : f32
    %39 = vector.broadcast %cst_18 : f32 to vector<8x256xf32>
    %40 = arith.cmpf oge, %10, %39 : vector<8x256xf32>
    %cst_19 = arith.constant 0.000000e+00 : f32
    %41 = vector.broadcast %cst_19 : f32 to vector<8x256xf32>
    %42 = arith.subf %41, %38 : vector<8x256xf32>
    %43 = arith.select %40, %38, %42 : vector<8x256xi1>, vector<8x256xf32>
    %cst_20 = arith.constant 1.000000e+00 : f32
    %44 = vector.broadcast %cst_20 : f32 to vector<8x256xf32>
    %45 = arith.addf %44, %43 : vector<8x256xf32>
    %46 = arith.mulf %8, %45 : vector<8x256xf32>
    %c0_21 = arith.constant 0 : index
    %c0_22 = arith.constant 0 : index
    %c0_23 = arith.constant 0 : index
    %47 = vector.load %arg4[%c0_21, %c0_22, %c0_23] : memref<1x8x256xf32, #tpu.memory_space<vmem>>, vector<1x8x256xf32>
    %48 = vector.shape_cast %47 : vector<1x8x256xf32> to vector<8x256xf32>
    %49 = vector.shape_cast %46 : vector<8x256xf32> to vector<1x8x256xf32>
    tpu.vector_store %arg4[%c0_21, %c0_22, %c0_23], %49 {strides = array<i32>} : memref<1x8x256xf32, #tpu.memory_space<vmem>>, vector<1x8x256xf32>,
    return
  }
  func.func @transform_0(%arg0: i32) -> (i32, i32, i32) {
    %c0_i32 = arith.constant 0 : i32
    %c0_i32_0 = arith.constant 0 : i32
    %c0_i32_1 = arith.constant 0 : i32
    return %arg0, %c0_i32, %c0_i32_0 : i32, i32, i32
  }
  func.func @transform_1(%arg0: i32) -> (i32, i32) {
    %c0_i32 = arith.constant 0 : i32
    %c0_i32_0 = arith.constant 0 : i32
    %c0_i32_1 = arith.constant 0 : i32
    return %c0_i32, %c0_i32_0 : i32, i32
  }
  func.func @transform_2(%arg0: i32) -> (i32, i32) {
    %c0_i32 = arith.constant 0 : i32
    %c0_i32_0 = arith.constant 0 : i32
    %c0_i32_1 = arith.constant 0 : i32
    return %c0_i32, %c0_i32_0 : i32, i32
  }
  func.func @transform_3(%arg0: i32) -> (i32, i32, i32) {
    %c0_i32 = arith.constant 0 : i32
    %c0_i32_0 = arith.constant 0 : i32
    %c0_i32_1 = arith.constant 0 : i32
    return %arg0, %c0_i32, %c0_i32_0 : i32, i32, i32
  }
}

</mosaic_0001>

<bundles_post_ra>
// kernel: conv_transpose_bn_gelu.1
= control target key start
LH: loop header
LB: loop body
LE: loop exit
PB: predicated region body
PF: predicated region fallthrough
CT: control target
= control target key end

     0   :  { %s445_s12 = smov 0   ;;  %s472_s0 = inlined_call_operand.vmem [shape: f32[2,36,256], index: 0, kind: input, shape index: {}]   ;;  %s473_s1 = inlined_call_operand.vmem [shape: f32[8,36], index: 1, kind: input, shape index: {}]   ;;  %s474_s2 = inlined_call_operand.vmem [shape: f32[8,1], index: 2, kind: input, shape index: {}]   ;;  %s475_s3 = inlined_call_operand.vmem [shape: f32[2,8,256], index: 3, kind: output, shape index: {}]  }
   0x1 LB: > { %s381_s13 = sadd.s32 4294967295, %s421_s12   ;;  %p385_p0 = scmp.ge.s32.totalorder %s421_s12, 1  ;;  %s421_s12 = sphi %s445_s12, %s13_s12  }
   0x2   : > { %p137_p1 = scmp.lt.s32.totalorder %s421_s12, 3 }
   0x4   : > { %p138_p2 = pnand %p385_p0, %p137_p1 }
   0x5   : > { %p161_p3 = scmp.lt.s32.totalorder (!%p138_p2), %s381_s13, 1 }
   0x6   : > { %141 = sbr.rel (%p138_p2) target bundleno = 275 (0x113), region = 32 }
   0xb   : > { %v423_v0 = vmov 0.0   ;;  %v424_v1 = vmov 0   ;;  %v182_v2 = vld [vmem:[%s474_s2] sm:$0xff]  ;;  %s477_s13 = smov (!%p161_p3, %s381_s13), 1  ;;  %vm192_vm0 = vcmask 1043456   ;;  %vm188_vm1 = vcmask 293888  }
   0xc   : > { %263 = vmatprep.mubr.f32.mxu0 %v423_v0  ;;  %406 = vset.pattern.permute.xlu0 %v424_v1  ;;  %s395_s16 = smul.u32 80, %s477_s13  ;;  %v171_v13 = vld [vmem:[%s473_s1] sm:$0xff]  ;;  %s394_s22 = sshll.u32 %s477_s13, 4 }
   0xd   : > { %185 = vperm.xlu0 %406, %v182_v2   ;;  %s170_s25 = scalar_lea.vmem %s475_s3, %s394_s22 }
   0xe   : > { %s165_s19 = scalar_lea.vmem %s472_s0, %s395_s16 }
   0xf   : > { %v181_v3 = vld [vmem:[%s165_s19 + $0x48] sm:$0xf]  ;;  %v180_v4 = vld [vmem:[%s165_s19 + $0x40] sm:$0xf]  ;;  %v179_v5 = vld [vmem:[%s165_s19 + $0x38] sm:$0xff] }
  0x10   : > { %389 = vmatprep.subr.msk.mxu0 %vm192_vm0, %v181_v3  ;;  %v178_v6 = vld [vmem:[%s165_s19 + $0x30] sm:$0xff]  ;;  %v177_v7 = vld [vmem:[%s165_s19 + $0x28] sm:$0xff]  ;;  %v176_v8 = vld [vmem:[%s165_s19 + $0x20] sm:$0xff] }
  0x11   : > { %390 = vmatpush1.msk.msra.mxu0 %vm192_vm0, %v180_v4  ;;  %v175_v9 = vld [vmem:[%s165_s19 + $0x18] sm:$0xff]  ;;  %v174_v10 = vld [vmem:[%s165_s19 + $0x10] sm:$0xff]  ;;  %v173_v11 = vld [vmem:[%s165_s19 + $0x8] sm:$0xff] }
  0x12   : > { %223 = vmatprep.subr.mxu0 %v179_v5  ;;  %v172_v12 = vld [vmem:[%s165_s19] sm:$0xff] }
  0x13   : > { %224 = vmatpush1.msra.mxu0 %v178_v6 }
  0x14   : > { %225 = vmatprep.subr.mxu0 %v177_v7 }
  0x15   : > { %226 = vmatpush1.msra.mxu0 %v176_v8 }
  0x16   : > { %227 = vmatprep.subr.mxu0 %v175_v9 }
  0x17   : > { %228 = vmatpush1.msra.mxu0 %v174_v10 }
  0x18   : > { %229 = vmatprep.subr.mxu0 %v173_v11 }
  0x19   : > { %230 = vmatpush1.msra.mxu0 %v172_v12 }
  0x1a   : > { %391 = vmatmul.mubr.msk.f32.vlgmr.msra.gmra.mxu0 %vm188_vm1, %v171_v13 }
  0x88   : > { %v186_v14 = vpop.permute.xlu0 %185 }
  0xda   : > { %v265_v15 = vpop.f32.mrf.mxu0 }
  0xdb   : > { %v266_v16 = vadd.f32 %v265_v15, %v186_v14 }
  0xdc   : > { %v267_v17 = vpop.f32.mrf.mxu0 }
  0xdd   : > { %v272_v18 = vmul.f32 0.70710677, %v266_v16  ;;  %v268_v19 = vadd.f32 %v267_v17, %v186_v14  ;;  %v270_v61 = vmul.f32 0.5, %v266_v16 }
  0xdf   : > { %v274_v20 = vand.u32 2147483647, %v272_v18  ;;  %v273_v21 = vmul.f32 0.70710677, %v268_v19  ;;  %vm314_vm2 = vcmp.ge.f32.partialorder %v272_v18, 0.0  ;;  %v271_v2 = vmul.f32 0.5, %v268_v19 }
  0xe1   : > { %v276_v22 = vmul.f32 0.3275911, %v274_v20  ;;  %v275_v23 = vand.u32 2147483647, %v273_v21  ;;  %v302_v27 = vsub.f32 0.0, %v274_v20  ;;  %vm315_vm3 = vcmp.ge.f32.partialorder %v273_v21, 0.0 }
  0xe3   : > { %v278_v24 = vadd.f32 1.0, %v276_v22  ;;  %v277_v25 = vmul.f32 0.3275911, %v275_v23  ;;  %v303_v28 = vsub.f32 0.0, %v275_v23  ;;  %v304_v29 = vmul.f32 %v302_v27, %v274_v20 }
  0xe5   : > { %407 = vrcp.f32 %v278_v24  ;;  %v279_v26 = vadd.f32 1.0, %v277_v25  ;;  %v305_v31 = vmul.f32 %v303_v28, %v275_v23  ;;  %v306_v33 = vmul.f32 1.442695, %v304_v29 }
  0xe7   : > { %409 = vrcp.f32 %v279_v26  ;;  %v308_v37 = vmul.f32 1.442695, %v305_v31 }
  0xe8   : > { %411 = vpow2.f32 %v306_v33 }
  0xe9   : > { %413 = vpow2.f32 %v308_v37 }
  0xf2   : > { %v408_v30 = vpop.eup %407 }
  0xf3   : > { %v284_v32 = vmul.f32 1.0614054, %v408_v30 }
  0xf4   : > { %v410_v34 = vpop.eup %409 }
  0xf5   : > { %v286_v35 = vadd.f32 -1.4531521, %v284_v32  ;;  %v285_v36 = vmul.f32 1.0614054, %v410_v34  ;;  %v412_v51 = vpop.eup %411 }
  0xf6   : > { %v414_v55 = vpop.eup %413 }
  0xf7   : > { %v288_v38 = vmul.f32 %v408_v30, %v286_v35  ;;  %v287_v39 = vadd.f32 -1.4531521, %v285_v36 }
  0xf9   : > { %v290_v40 = vadd.f32 1.4214138, %v288_v38  ;;  %v289_v41 = vmul.f32 %v410_v34, %v287_v39 }
  0xfb   : > { %v292_v42 = vmul.f32 %v408_v30, %v290_v40  ;;  %v291_v43 = vadd.f32 1.4214138, %v289_v41 }
  0xfd   : > { %v294_v44 = vadd.f32 -0.28449672, %v292_v42  ;;  %v293_v45 = vmul.f32 %v410_v34, %v291_v43 }
  0xff   : > { %v296_v46 = vmul.f32 %v408_v30, %v294_v44  ;;  %v295_v47 = vadd.f32 -0.28449672, %v293_v45 }
 0x101   : > { %v298_v48 = vadd.f32 0.2548296, %v296_v46  ;;  %v297_v49 = vmul.f32 %v410_v34, %v295_v47 }
 0x103   : > { %v300_v50 = vmul.f32 %v408_v30, %v298_v48  ;;  %v299_v52 = vadd.f32 0.2548296, %v297_v49 }
 0x105   : > { %v310_v53 = vmul.f32 %v412_v51, %v300_v50  ;;  %v301_v54 = vmul.f32 %v410_v34, %v299_v52 }
 0x107   : > { %v312_v56 = vsub.f32 1.0, %v310_v53  ;;  %v311_v57 = vmul.f32 %v414_v55, %v301_v54 }
 0x109   : > { %v316_v58 = vsub.f32 0.0, %v312_v56  ;;  %v313_v59 = vsub.f32 1.0, %v311_v57 }
 0x10b   : > { %v318_v60 = vsel %vm314_vm2, %v312_v56, %v316_v58  ;;  %v317_v63 = vsub.f32 0.0, %v313_v59 }
 0x10c   : > { %v320_v62 = vadd.f32 1.0, %v318_v60 }
 0x10d   : > { %v319_v1 = vsel %vm315_vm3, %v313_v59, %v317_v63 }
 0x10e   : > { %v322_v0 = vmul.f32 %v320_v62, %v270_v61  ;;  %v321_v3 = vadd.f32 1.0, %v319_v1 }
 0x110   : > { %324 = vst [vmem:[%s170_s25] sm:$0xff] %v322_v0  ;;  %v323_v4 = vmul.f32 %v321_v3, %v271_v2 }
 0x112   : > { %325 = vst [vmem:[%s170_s25 + $0x8] sm:$0xff] %v323_v4 }
 0x113 PF: > { %s13_s12 = sadd.s32 1, %s421_s12  }
 0x114   : > { %p10_p4 = scmp.ge.s32.totalorder %s13_s12, 4  }
 0x116   :  { %12 = sbr.rel (!%p10_p4) target bundleno = 1 (0x1), region = 62 }

</bundles_post_ra>
